<compile_context>
chip_gen: v7x
topology: tpu7x:2x2x1
jax: 0.10.0
libtpu: 0.0.40
codegen_flags: <defaults>
</compile_context>

<pallas_src>
import numpy as np

import jax
import jax.numpy as jnp
from jax import lax
from jax.experimental import pallas as pl
from jax.experimental.pallas import tpu as pltpu


def _round_up(x, m):
    return ((x + m - 1) // m) * m


def _adaptive_bins(length, out_len):
    """PyTorch AdaptiveAvgPool1d bin boundaries (static python ints)."""
    bins = []
    for i in range(out_len):
        s = (i * length) // out_len
        e = -(-((i + 1) * length) // out_len)  # ceil division
        bins.append((s, e))
    return bins


def _conv_band(w, b, L_in, stride, rows_pad, cols_pad):
    """Band matrix + bias row for a VALID Conv1d.

    Input layout on rows:  ci * L_in + position.
    Output layout on cols: co * L_out + position.
    Returns (band (rows_pad, cols_pad), bias_row (1, cols_pad), L_out).
    """
    c_out, c_in, k = w.shape
    L_out = (L_in - k) // stride + 1
    band = np.zeros((rows_pad, cols_pad), dtype=np.float32)
    bias = np.zeros((1, cols_pad), dtype=np.float32)
    t = np.arange(L_out)
    for co in range(c_out):
        cols = co * L_out + t
        bias[0, cols] = float(b[co])
        for ci in range(c_in):
            for kk in range(k):
                band[ci * L_in + t * stride + kk, cols] = float(w[co, ci, kk])
    return band, bias, L_out


def _pool_matrix(c, L_in, pool_len, rows_pad, cols_pad):
    """Block-diagonal adaptive-average-pool matrix (rows_pad, cols_pad)."""
    mat = np.zeros((rows_pad, cols_pad), dtype=np.float32)
    for p, (s, e) in enumerate(_adaptive_bins(L_in, pool_len)):
        inv = 1.0 / float(e - s)
        for j in range(c):
            mat[j * L_in + s: j * L_in + e, j * pool_len + p] = inv
    return mat


def _kernel(x_ref, w1_ref, b1_ref, w2_ref, b2_ref, pool_ref, o_ref):
    # x:  (B, cin*L)   bf16 lane-dense batch tile
    # h1: (B, H1)      conv1: bf16 MXU matmul, f32 accum + bias + ReLU
    # h2: (B, H2)      conv2: bf16 MXU matmul, f32 accum + bias + ReLU
    # o:  (B, OUTP)    adaptive avg pool: bf16 MXU matmul, f32 store
    x = x_ref[...]
    h1 = jnp.dot(x, w1_ref[...], preferred_element_type=jnp.float32)
    h1 = jnp.maximum(h1 + b1_ref[...], 0.0)
    h2 = jnp.dot(h1.astype(jnp.bfloat16), w2_ref[...],
                 preferred_element_type=jnp.float32)
    h2 = jnp.maximum(h2 + b2_ref[...], 0.0)
    o_ref[...] = jnp.dot(h2.astype(jnp.bfloat16), pool_ref[...],
                         preferred_element_type=jnp.float32).astype(o_ref.dtype)


def make_starnet_convs(w1, b1, w2, b2, input_length, strides=(1, 1),
                       pool_length=4, block_batch=2048):
    """Build the StarNet_convs forward once.

    Host band/pool-matrix construction and the device upload happen here (not
    per call).  Returns a jitted function  x (N, cin, L) f32 -> (N, c2, pool).
    Weights use PyTorch Conv1d layout: w1 (c1, cin, k1), b1 (c1,),
    w2 (c2, c1, k2), b2 (c2,).
    """
    w1_np = np.asarray(w1, dtype=np.float32)
    b1_np = np.asarray(b1, dtype=np.float32)
    w2_np = np.asarray(w2, dtype=np.float32)
    b2_np = np.asarray(b2, dtype=np.float32)

    c1, cin, k1 = w1_np.shape
    c2, _, k2 = w2_np.shape
    s1, s2 = strides
    L = int(input_length)

    K0 = cin * L
    L1 = (L - k1) // s1 + 1
    L2 = (L1 - k2) // s2 + 1
    H1 = _round_up(c1 * L1, 128)           # padded conv1 output width (lanes)
    H2 = _round_up(c2 * L2, 128)           # padded conv2 output width (lanes)
    OUT = c2 * pool_length                 # true pooled output width
    OUTP = _round_up(OUT, 128)             # lane-dense padded output width

    w1band, b1row, _ = _conv_band(w1_np, b1_np, L, s1, K0, H1)
    w2band, b2row, _ = _conv_band(w2_np, b2_np, L1, s2, H1, H2)
    poolmat = _pool_matrix(c2, L2, pool_length, H2, OUTP)

    # Matmul operands in bf16 (accumulation stays f32 in-kernel); biases stay
    # f32 for an exact epilogue.
    w1_d = jnp.asarray(w1band, dtype=jnp.bfloat16)
    b1_d = jnp.asarray(b1row, dtype=jnp.float32)
    w2_d = jnp.asarray(w2band, dtype=jnp.bfloat16)
    b2_d = jnp.asarray(b2row, dtype=jnp.float32)
    pool_d = jnp.asarray(poolmat, dtype=jnp.bfloat16)

    weight_bytes = ((w1_d.size + w2_d.size + pool_d.size) * 2
                    + (b1_d.size + b2_d.size) * 4)

    @jax.jit
    def apply(x_ncl):
        N = x_ncl.shape[0]
        assert x_ncl.shape[1:] == (cin, L), x_ncl.shape

        # Block-batch choice: >= 2 grid steps whenever N allows it so the
        # "parallel" axis shards across both v7x TensorCores; multiple-of-8
        # sublane tiles; capped so the tile fits 64 MiB VMEM comfortably.
        Nr = _round_up(N, 8)
        B = min(int(block_batch), max(8, _round_up(-(-Nr // 2), 8)))
        Npad = _round_up(N, B)
        grid = Npad // B

        # Explicit VMEM budget: double-buffered streamed I/O + (double-
        # buffered) resident weights + materialized f32 intermediates.
        io_bytes = 2 * (B * K0 * 2) + 2 * (B * OUTP * 4)
        scratch_bytes = B * (H1 + H2) * 4
        vmem_limit = int(min(56 << 20,
                             max(32 << 20,
                                 2 * weight_bytes + 2 * io_bytes
                                 + 2 * scratch_bytes)))

        x2d = x_ncl.reshape(N, K0).astype(jnp.bfloat16)   # lane-dense, bf16 DMA
        if Npad != N:
            x2d = jnp.pad(x2d, ((0, Npad - N), (0, 0)))

        out2d = pl.pallas_call(
            _kernel,
            out_shape=jax.ShapeDtypeStruct((Npad, OUTP), jnp.float32),
            grid=(grid,),
            in_specs=[
                pl.BlockSpec((B, K0), lambda i: (i, 0)),     # streamed batch tile
                # Resident (constant-index) operands.  Single-buffering them
                # (pipeline_mode=pl.Buffered(1)) would save ~0.7 MiB of VMEM;
                # left double-buffered since the budget here is tiny.
                pl.BlockSpec((K0, H1), lambda i: (0, 0)),
                pl.BlockSpec((1, H1), lambda i: (0, 0)),
                pl.BlockSpec((H1, H2), lambda i: (0, 0)),
                pl.BlockSpec((1, H2), lambda i: (0, 0)),
                pl.BlockSpec((H2, OUTP), lambda i: (0, 0)),
            ],
            out_specs=pl.BlockSpec((B, OUTP), lambda i: (i, 0)),
            compiler_params=pltpu.CompilerParams(
                dimension_semantics=("parallel",),
                vmem_limit_bytes=vmem_limit),
        )(x2d, w1_d, b1_d, w2_d, b2_d, pool_d)

        # Drop padded batch rows and the zero lane padding, then split the
        # channel-major columns into (c2, pool).
        return out2d[:N, :OUT].reshape(N, c2, pool_length)

    return apply


def _reference_forward(x_ncl, w1, b1, w2, b2, strides=(1, 1), pool_length=4):
    """Pure-JAX reference mirroring the PyTorch module (for validation)."""
    def conv1d(x, w, b, stride):
        y = lax.conv_general_dilated(
            x, w, window_strides=(stride,), padding="VALID",
            dimension_numbers=("NCW", "OIW", "NCW"))
        return y + b[None, :, None]

    h = jnp.maximum(conv1d(x_ncl, w1, b1, strides[0]), 0.0)
    h = jnp.maximum(conv1d(h, w2, b2, strides[1]), 0.0)
    L2 = h.shape[-1]
    cols = []
    for (s, e) in _adaptive_bins(L2, pool_length):
        cols.append(jnp.mean(h[:, :, s:e], axis=-1, keepdims=True))
    return jnp.concatenate(cols, axis=-1)


if __name__ == "__main__":
    # Module defaults: in_channels=1, num_filters=[4,16], strides=[1,1],
    # filter_lengths=[8,8], pool_length=4, input_dropout=0.0 (no dropout layer).
    N, CIN, L = 10, 1, 64
    C1, K1 = 4, 8
    C2, K2 = 16, 8
    POOL = 4

    key = jax.random.PRNGKey(0)
    kx, kw1, kb1, kw2, kb2 = jax.random.split(key, 5)

    x = jax.random.normal(kx, (N, CIN, L), dtype=jnp.float32)
    # Deterministic synthetic parameters (Conv1d weight layout: (out, in, k)).
    w1 = 0.1 * jax.random.normal(kw1, (C1, CIN, K1), dtype=jnp.float32)
    b1 = 0.1 * jax.random.normal(kb1, (C1,), dtype=jnp.float32)
    w2 = 0.1 * jax.random.normal(kw2, (C2, C1, K2), dtype=jnp.float32)
    b2 = 0.1 * jax.random.normal(kb2, (C2,), dtype=jnp.float32)

    # Band/pool matrices built + uploaded once; apply() is jitted.
    fwd = make_starnet_convs(w1, b1, w2, b2, input_length=L, strides=(1, 1),
                             pool_length=POOL)
    out = jax.block_until_ready(fwd(x))   # N=10 -> B=8, grid=2 (multi-step + pad)

    ref = jax.block_until_ready(
        _reference_forward(x, w1, b1, w2, b2, strides=(1, 1), pool_length=POOL))

    assert out.shape == (N, C2, POOL), out.shape
    max_err = float(jnp.max(jnp.abs(out - ref)))
    scale = float(jnp.max(jnp.abs(ref)))
    # bf16 matmul operands with f32 accumulation: expect ~1e-2 relative error.
    assert max_err <= 2e-2 * max(scale, 1.0), (max_err, scale)

    print("KERNEL_OK")
</pallas_src>

<mosaic_0001>
module attributes {stable_mosaic.version = 11 : i64} {
  func.func @_kernel(%arg0: i32, %arg1: memref<8x64xbf16, #tpu.memory_space<vmem>>, %arg2: memref<64x256xbf16, #tpu.memory_space<vmem>>, %arg3: memref<1x256xf32, #tpu.memory_space<vmem>>, %arg4: memref<256x896xbf16, #tpu.memory_space<vmem>>, %arg5: memref<1x896xf32, #tpu.memory_space<vmem>>, %arg6: memref<896x128xbf16, #tpu.memory_space<vmem>>, %arg7: memref<8x128xf32, #tpu.memory_space<vmem>>) attributes {dimension_semantics = [#tpu.dimension_semantics<parallel>], iteration_bounds = array<i64: 2>, scalar_prefetch = 0 : i64, scratch_operands = 0 : i64, tpu.core_type = #tpu.core_type<tc>, window_params = [{transform_indices = @transform_0, window_bounds = array<i64: 8, 64>}, {pipeline_mode = #tpu.pipeline_mode<synchronous>, transform_indices = @transform_1, window_bounds = array<i64: 64, 256>}, {pipeline_mode = #tpu.pipeline_mode<synchronous>, transform_indices = @transform_2, window_bounds = array<i64: 1, 256>}, {pipeline_mode = #tpu.pipeline_mode<synchronous>, transform_indices = @transform_3, window_bounds = array<i64: 256, 896>}, {pipeline_mode = #tpu.pipeline_mode<synchronous>, transform_indices = @transform_4, window_bounds = array<i64: 1, 896>}, {pipeline_mode = #tpu.pipeline_mode<synchronous>, transform_indices = @transform_5, window_bounds = array<i64: 896, 128>}, {transform_indices = @transform_6, window_bounds = array<i64: 8, 128>}]} {
    %c0 = arith.constant 0 : index
    %c0_0 = arith.constant 0 : index
    %0 = vector.load %arg1[%c0, %c0_0] : memref<8x64xbf16, #tpu.memory_space<vmem>>, vector<8x64xbf16>
    %c0_1 = arith.constant 0 : index
    %c0_2 = arith.constant 0 : index
    %1 = vector.load %arg2[%c0_1, %c0_2] : memref<64x256xbf16, #tpu.memory_space<vmem>>, vector<64x256xbf16>
    %cst = arith.constant dense<0.000000e+00> : vector<8x256xf32>
    %2 = tpu.matmul %0, %1, %cst {dimension_numbers = #tpu.dot_dimension_numbers<[1], [0], [0], [1], [0, 0, 1, 1], [], []>} : vector<8x64xbf16>, vector<64x256xbf16>, vector<8x256xf32> -> vector<8x256xf32>
    %c0_3 = arith.constant 0 : index
    %c0_4 = arith.constant 0 : index
    %3 = vector.load %arg3[%c0_3, %c0_4] : memref<1x256xf32, #tpu.memory_space<vmem>>, vector<1x256xf32>
    %4 = vector.broadcast %3 : vector<1x256xf32> to vector<8x256xf32>
    %5 = arith.addf %2, %4 : vector<8x256xf32>
    %cst_5 = arith.constant 0.000000e+00 : f32
    %6 = vector.broadcast %cst_5 : f32 to vector<8x256xf32>
    %7 = arith.maximumf %5, %6 : vector<8x256xf32>
    %8 = arith.truncf %7 : vector<8x256xf32> to vector<8x256xbf16>
    %c0_6 = arith.constant 0 : index
    %c0_7 = arith.constant 0 : index
    %9 = vector.load %arg4[%c0_6, %c0_7] : memref<256x896xbf16, #tpu.memory_space<vmem>>, vector<256x896xbf16>
    %cst_8 = arith.constant dense<0.000000e+00> : vector<8x896xf32>
    %10 = tpu.matmul %8, %9, %cst_8 {dimension_numbers = #tpu.dot_dimension_numbers<[1], [0], [0], [1], [0, 0, 1, 1], [], []>} : vector<8x256xbf16>, vector<256x896xbf16>, vector<8x896xf32> -> vector<8x896xf32>
    %c0_9 = arith.constant 0 : index
    %c0_10 = arith.constant 0 : index
    %11 = vector.load %arg5[%c0_9, %c0_10] : memref<1x896xf32, #tpu.memory_space<vmem>>, vector<1x896xf32>
    %12 = vector.broadcast %11 : vector<1x896xf32> to vector<8x896xf32>
    %13 = arith.addf %10, %12 : vector<8x896xf32>
    %cst_11 = arith.constant 0.000000e+00 : f32
    %14 = vector.broadcast %cst_11 : f32 to vector<8x896xf32>
    %15 = arith.maximumf %13, %14 : vector<8x896xf32>
    %16 = arith.truncf %15 : vector<8x896xf32> to vector<8x896xbf16>
    %c0_12 = arith.constant 0 : index
    %c0_13 = arith.constant 0 : index
    %17 = vector.load %arg6[%c0_12, %c0_13] : memref<896x128xbf16, #tpu.memory_space<vmem>>, vector<896x128xbf16>
    %cst_14 = arith.constant dense<0.000000e+00> : vector<8x128xf32>
    %18 = tpu.matmul %16, %17, %cst_14 {dimension_numbers = #tpu.dot_dimension_numbers<[1], [0], [0], [1], [0, 0, 1, 1], [], []>} : vector<8x896xbf16>, vector<896x128xbf16>, vector<8x128xf32> -> vector<8x128xf32>
    %c0_15 = arith.constant 0 : index
    %c0_16 = arith.constant 0 : index
    %19 = vector.load %arg7[%c0_15, %c0_16] : memref<8x128xf32, #tpu.memory_space<vmem>>, vector<8x128xf32>
    tpu.vector_store %arg7[%c0_15, %c0_16], %18 {strides = array<i32>} : memref<8x128xf32, #tpu.memory_space<vmem>>, vector<8x128xf32>,
    return
  }
  func.func @transform_0(%arg0: i32) -> (i32, i32) {
    %c0_i32 = arith.constant 0 : i32
    %c0_i32_0 = arith.constant 0 : i32
    return %arg0, %c0_i32 : i32, i32
  }
  func.func @transform_1(%arg0: i32) -> (i32, i32) {
    %c0_i32 = arith.constant 0 : i32
    %c0_i32_0 = arith.constant 0 : i32
    %c0_i32_1 = arith.constant 0 : i32
    return %c0_i32, %c0_i32_0 : i32, i32
  }
  func.func @transform_2(%arg0: i32) -> (i32, i32) {
    %c0_i32 = arith.constant 0 : i32
    %c0_i32_0 = arith.constant 0 : i32
    %c0_i32_1 = arith.constant 0 : i32
    return %c0_i32, %c0_i32_0 : i32, i32
  }
  func.func @transform_3(%arg0: i32) -> (i32, i32) {
    %c0_i32 = arith.constant 0 : i32
    %c0_i32_0 = arith.constant 0 : i32
    %c0_i32_1 = arith.constant 0 : i32
    return %c0_i32, %c0_i32_0 : i32, i32
  }
  func.func @transform_4(%arg0: i32) -> (i32, i32) {
    %c0_i32 = arith.constant 0 : i32
    %c0_i32_0 = arith.constant 0 : i32
    %c0_i32_1 = arith.constant 0 : i32
    return %c0_i32, %c0_i32_0 : i32, i32
  }
  func.func @transform_5(%arg0: i32) -> (i32, i32) {
    %c0_i32 = arith.constant 0 : i32
    %c0_i32_0 = arith.constant 0 : i32
    %c0_i32_1 = arith.constant 0 : i32
    return %c0_i32, %c0_i32_0 : i32, i32
  }
  func.func @transform_6(%arg0: i32) -> (i32, i32) {
    %c0_i32 = arith.constant 0 : i32
    %c0_i32_0 = arith.constant 0 : i32
    return %arg0, %c0_i32 : i32, i32
  }
}

</mosaic_0001>

<bundles_post_ra>
// kernel: apply.1
= control target key start
LH: loop header
LB: loop body
LE: loop exit
PB: predicated region body
PF: predicated region fallthrough
CT: control target
= control target key end

     0   :  { %s2526_s21 = smov 0   ;;  %s3122_s0 = inlined_call_operand.vmem [shape: bf16[16,64], index: 0, kind: input, shape index: {}]   ;;  %s3123_s1 = inlined_call_operand.vmem [shape: bf16[64,256], index: 1, kind: input, shape index: {}]   ;;  %s3124_s2 = inlined_call_operand.vmem [shape: f32[1,256], index: 2, kind: input, shape index: {}]   ;;  %s3125_s3 = inlined_call_operand.vmem [shape: bf16[256,896], index: 3, kind: input, shape index: {}]   ;;  %s3126_s4 = inlined_call_operand.vmem [shape: f32[1,896], index: 4, kind: input, shape index: {}]   ;;  %s3127_s5 = inlined_call_operand.vmem [shape: bf16[896,128], index: 5, kind: input, shape index: {}]   ;;  %s3128_s6 = inlined_call_operand.vmem [shape: f32[16,128], index: 6, kind: output, shape index: {}]  }
   0x1 LB: > { %s1938_s22 = sadd.s32 4294967295, %s2486_s21   ;;  %p1942_p0 = scmp.ge.s32.totalorder %s2486_s21, 1  ;;  %s2486_s21 = sphi %s2526_s21, %s16_s21  }
   0x2   : > { %p211_p1 = scmp.lt.s32.totalorder %s2486_s21, 3 }
   0x4   : > { %p212_p2 = pnand %p1942_p0, %p211_p1 }
   0x5   : > { %v2252_v0 = vld [vmem:[%s3123_s1 + $0x4] ss:$8 sps:$4 sm:$0xff] (!%p212_p2)   ;;  %p239_p3 = scmp.lt.s32.totalorder (!%p212_p2), %s1938_s22, 1  ;;  %v2254_v1 = vld [vmem:[%s3123_s1] ss:$8 sps:$4 sm:$0xff] (!%p212_p2)   ;;  %v2488_v2 = vmov (!%p212_p2), 0  }
   0x6   : > { %215 = sbr.rel (%p212_p2) target bundleno = 746 (0x2ea), region = 44  ;;  %345 = vmatprep.mubr.bf16.mxu0 (!%p212_p2), %v2488_v2  ;;  %313 = vmatprep.subr.bf16.mxu0 (!%p212_p2), %v2252_v0  ;;  %v2255_v3 = vld [vmem:[%s3123_s1 + $0x14] ss:$8 sps:$4 sm:$0xff] (!%p212_p2)   ;;  %v2257_v4 = vld [vmem:[%s3123_s1 + $0x10] ss:$8 sps:$4 sm:$0xff] (!%p212_p2)   ;;  %vm309_vm0 = vcmask (!%p212_p2), 523264  }
   0x7   : > { %314 = vmatpush1.bf16.msra.mxu0 (!%p212_p2), %v2254_v1  ;;  %v2258_v5 = vld [vmem:[%s3123_s1 + $0x24] ss:$8 sps:$4 sm:$0xff] (!%p212_p2)   ;;  %v2260_v7 = vld [vmem:[%s3123_s1 + $0x20] ss:$8 sps:$4 sm:$0xff] (!%p212_p2)   ;;  %v2261_v8 = vld [vmem:[%s3123_s1 + $0x34] ss:$8 sps:$4 sm:$0xff] (!%p212_p2)  }
   0x8   : > { %315 = vmatprep.subr.bf16.mxu0 (!%p212_p2), %v2255_v3  ;;  %v2264_v6 = vld [vmem:[%s3125_s3 + $0x4] ss:$28 sps:$4 sm:$0xff] (!%p212_p2)   ;;  %v2270_v10 = vld [vmem:[%s3125_s3 + $0x3c] ss:$28 sps:$4 sm:$0xff] (!%p212_p2)   ;;  %v2276_v13 = vld [vmem:[%s3125_s3 + $0x74] ss:$28 sps:$4 sm:$0xff] (!%p212_p2)  }
   0x9   : > { %1099 = vmatprep.subr.bf16.mxu1 (!%p212_p2), %v2264_v6  ;;  %v2269_v9 = vld [vmem:[%s3125_s3] ss:$28 sps:$4 sm:$0xff] (!%p212_p2)   ;;  %v2263_v11 = vld [vmem:[%s3123_s1 + $0x30] ss:$8 sps:$4 sm:$0xff] (!%p212_p2)   ;;  %v2268_v14 = vld [vmem:[%s3125_s3 + $0xc] ss:$28 sps:$4 sm:$0xff] (!%p212_p2)  }
   0xa   : > { %1100 = vmatpush1.bf16.msra.mxu1 (!%p212_p2), %v2269_v9  ;;  %v2275_v12 = vld [vmem:[%s3125_s3 + $0x38] ss:$28 sps:$4 sm:$0xff] (!%p212_p2)   ;;  %v2281_v16 = vld [vmem:[%s3125_s3 + $0x70] ss:$28 sps:$4 sm:$0xff] (!%p212_p2)   ;;  %v2266_v17 = vld [vmem:[%s3125_s3 + $0x8] ss:$28 sps:$4 sm:$0xff] (!%p212_p2)  }
   0xb   : > { %316 = vmatpush1.bf16.msra.mxu0 (!%p212_p2), %v2257_v4  ;;  %1101 = vmatprep.subr.bf16.mxu1 (!%p212_p2), %v2270_v10  ;;  %v2282_v18 = vld [vmem:[%s3125_s3 + $0xac] ss:$28 sps:$4 sm:$0xff] (!%p212_p2)   ;;  %v2274_v19 = vld [vmem:[%s3125_s3 + $0x44] ss:$28 sps:$4 sm:$0xff] (!%p212_p2)   ;;  %v2280_v23 = vld [vmem:[%s3125_s3 + $0x7c] ss:$28 sps:$4 sm:$0xff] (!%p212_p2)  }
   0xc   : > { %317 = vmatprep.subr.bf16.mxu0 (!%p212_p2), %v2258_v5  ;;  %v2272_v20 = vld [vmem:[%s3125_s3 + $0x40] ss:$28 sps:$4 sm:$0xff] (!%p212_p2)   ;;  %v2287_v21 = vld [vmem:[%s3125_s3 + $0xa8] ss:$28 sps:$4 sm:$0xff] (!%p212_p2)   ;;  %v2278_v25 = vld [vmem:[%s3125_s3 + $0x78] ss:$28 sps:$4 sm:$0xff] (!%p212_p2)  }
   0xd   : > { %s3130_s22 = smov (!%p239_p3, %s1938_s22), 1  ;;  %v2288_v22 = vld [vmem:[%s3125_s3 + $0xe4] ss:$28 sps:$4 sm:$0xff]   ;;  %v2294_v26 = vld [vmem:[%s3125_s3 + $0x11c] ss:$28 sps:$4 sm:$0xff]   ;;  %vm2490_vm1 = vmmov 0  }
   0xe   : > { %s1943_s15 = sshll.u32 %s3130_s22, 2  ;;  %1102 = vmatpush1.bf16.msra.mxu1 %v2275_v12  ;;  %v2293_v24 = vld [vmem:[%s3125_s3 + $0xe0] ss:$28 sps:$4 sm:$0xff]   ;;  %v2286_v27 = vld [vmem:[%s3125_s3 + $0xb4] ss:$28 sps:$4 sm:$0xff]   ;;  %v259_v12 = vlaneseq  ;;  %s1944_s7 = sshll.u32 %s3130_s22, 3 }
   0xf   : > { %s242_s26 = scalar_lea.vmem %s3122_s0, %s1943_s15  ;;  %318 = vmatpush1.bf16.msra.mxu0 %v2260_v7  ;;  %1103 = vmatprep.subr.bf16.mxu1 %v2276_v13  ;;  %v2284_v28 = vld [vmem:[%s3125_s3 + $0xb0] ss:$28 sps:$4 sm:$0xff]   ;;  %v2299_v29 = vld [vmem:[%s3125_s3 + $0x118] ss:$28 sps:$4 sm:$0xff]   ;;  %v2290_v33 = vld [vmem:[%s3125_s3 + $0xe8] ss:$28 sps:$4 sm:$0xff]   ;;  %s246_s10 = scalar_lea.vmem %s3128_s6, %s1944_s7 }
  0x10   : > { %319 = vmatprep.subr.bf16.mxu0 %v2261_v8  ;;  %v248_v15 = vld [vmem:[%s242_s26] sm:$0xf]  ;;  %v2300_v30 = vld [vmem:[%s3125_s3 + $0x154] ss:$28 sps:$4 sm:$0xff]   ;;  %v2292_v31 = vld [vmem:[%s3125_s3 + $0xec] ss:$28 sps:$4 sm:$0xff]  }
  0x11   : > { %v2305_v32 = vld [vmem:[%s3125_s3 + $0x150] ss:$28 sps:$4 sm:$0xff]   ;;  %v2298_v35 = vld [vmem:[%s3125_s3 + $0x124] ss:$28 sps:$4 sm:$0xff]   ;;  %v2304_v39 = vld [vmem:[%s3125_s3 + $0x15c] ss:$28 sps:$4 sm:$0xff]  }
  0x12   : > { %1104 = vmatpush1.bf16.msra.mxu1 %v2281_v16  ;;  %v2306_v34 = vld [vmem:[%s3125_s3 + $0x18c] ss:$28 sps:$4 sm:$0xff]   ;;  %v2296_v36 = vld [vmem:[%s3125_s3 + $0x120] ss:$28 sps:$4 sm:$0xff]   ;;  %v2302_v41 = vld [vmem:[%s3125_s3 + $0x158] ss:$28 sps:$4 sm:$0xff]  }
  0x13   : > { %320 = vmatpush1.bf16.msra.mxu0 %v2263_v11  ;;  %1105 = vmatprep.subr.bf16.mxu1 %v2282_v18  ;;  %v2311_v37 = vld [vmem:[%s3125_s3 + $0x188] ss:$28 sps:$4 sm:$0xff]   ;;  %v2317_v40 = vld [vmem:[%s3125_s3 + $0x1c0] ss:$28 sps:$4 sm:$0xff]   ;;  %v2310_v43 = vld [vmem:[%s3125_s3 + $0x194] ss:$28 sps:$4 sm:$0xff]  }
  0x14   : > { %1140 = vmatprep.subr.bf16.mxu0 %v2268_v14  ;;  %v2312_v38 = vld [vmem:[%s3125_s3 + $0x1c4] ss:$28 sps:$4 sm:$0xff]   ;;  %v2318_v42 = vld [vmem:[%s3125_s3 + $0x1fc] ss:$28 sps:$4 sm:$0xff]   ;;  %v2308_v44 = vld [vmem:[%s3125_s3 + $0x190] ss:$28 sps:$4 sm:$0xff]  }
  0x15   : > { %v2316_v45 = vld [vmem:[%s3125_s3 + $0x1cc] ss:$28 sps:$4 sm:$0xff]   ;;  %v2323_v46 = vld [vmem:[%s3125_s3 + $0x1f8] ss:$28 sps:$4 sm:$0xff]   ;;  %v2322_v51 = vld [vmem:[%s3125_s3 + $0x204] ss:$28 sps:$4 sm:$0xff]  }
  0x16   : > { %1953 = vmatmul.mubr.msk.bf16.vlgmr.msra.gmra.mrb[0].mxu0 %vm309_vm0, %v248_v15  ;;  %1106 = vmatpush1.bf16.msra.mxu1 %v2287_v21  ;;  %v2324_v47 = vld [vmem:[%s3125_s3 + $0x234] ss:$28 sps:$4 sm:$0xff]   ;;  %v2314_v49 = vld [vmem:[%s3125_s3 + $0x1c8] ss:$28 sps:$4 sm:$0xff]   ;;  %v2320_v53 = vld [vmem:[%s3125_s3 + $0x200] ss:$28 sps:$4 sm:$0xff]  }
  0x17   : > { %1141 = vmatpush1.bf16.msra.mxu0 %v2266_v17  ;;  %1107 = vmatprep.subr.bf16.mxu1 %v2288_v22  ;;  %v2329_v48 = vld [vmem:[%s3125_s3 + $0x230] ss:$28 sps:$4 sm:$0xff]   ;;  %v2335_v52 = vld [vmem:[%s3125_s3 + $0x268] ss:$28 sps:$4 sm:$0xff]   ;;  %v2328_v55 = vld [vmem:[%s3125_s3 + $0x23c] ss:$28 sps:$4 sm:$0xff]  }
  0x18   : > { %1142 = vmatprep.subr.bf16.mxu0 %v2274_v19  ;;  %v2330_v50 = vld [vmem:[%s3125_s3 + $0x26c] ss:$28 sps:$4 sm:$0xff]   ;;  %v2336_v54 = vld [vmem:[%s3125_s3 + $0x2a4] ss:$28 sps:$4 sm:$0xff]   ;;  %v2326_v57 = vld [vmem:[%s3125_s3 + $0x238] ss:$28 sps:$4 sm:$0xff]  }
  0x19   : > { %v2341_v56 = vld [vmem:[%s3125_s3 + $0x2a0] ss:$28 sps:$4 sm:$0xff]   ;;  %v2334_v59 = vld [vmem:[%s3125_s3 + $0x274] ss:$28 sps:$4 sm:$0xff]   ;;  %v2340_v62 = vld [vmem:[%s3125_s3 + $0x2ac] ss:$28 sps:$4 sm:$0xff]  }
  0x1a   : > { %1108 = vmatpush1.bf16.msra.mxu1 %v2293_v24  ;;  %v2342_v58 = vld [vmem:[%s3125_s3 + $0x2dc] ss:$28 sps:$4 sm:$0xff]   ;;  %v2332_v61 = vld [vmem:[%s3125_s3 + $0x270] ss:$28 sps:$4 sm:$0xff]   ;;  %v2338_v63 = vld [vmem:[%s3125_s3 + $0x2a8] ss:$28 sps:$4 sm:$0xff]  }
  0x1b   : > { %1143 = vmatpush1.bf16.msra.mxu0 %v2272_v20  ;;  %1109 = vmatprep.subr.bf16.mxu1 %v2294_v26  ;;  %v2347_v60 = vld [vmem:[%s3125_s3 + $0x2d8] ss:$28 sps:$4 sm:$0xff]   ;;  %v2346_v0 = vld [vmem:[%s3125_s3 + $0x2e4] ss:$28 sps:$4 sm:$0xff]   ;;  %v2353_v5 = vld [vmem:[%s3125_s3 + $0x310] ss:$28 sps:$4 sm:$0xff]  }
  0x1c   : > { %1144 = vmatprep.subr.bf16.mxu0 %v2280_v23  ;;  %v2344_v1 = vld [vmem:[%s3125_s3 + $0x2e0] ss:$28 sps:$4 sm:$0xff]   ;;  %v2348_v2 = vld [vmem:[%s3125_s3 + $0x314] ss:$28 sps:$4 sm:$0xff]   ;;  %v2354_v6 = vld [vmem:[%s3125_s3 + $0x34c] ss:$28 sps:$4 sm:$0xff]  }
  0x1d   : > { %v2352_v3 = vld [vmem:[%s3125_s3 + $0x31c] ss:$28 sps:$4 sm:$0xff]   ;;  %v2358_v7 = vld [vmem:[%s3125_s3 + $0x354] ss:$28 sps:$4 sm:$0xff]   ;;  %v2359_v9 = vld [vmem:[%s3125_s3 + $0x348] ss:$28 sps:$4 sm:$0xff]  }
  0x1e   : > { %1110 = vmatpush1.bf16.msra.mxu1 %v2299_v29  ;;  %v2350_v4 = vld [vmem:[%s3125_s3 + $0x318] ss:$28 sps:$4 sm:$0xff]   ;;  %v2356_v8 = vld [vmem:[%s3125_s3 + $0x350] ss:$28 sps:$4 sm:$0xff]   ;;  %v2762_v13 = vshrl.u32 %v259_v12, 7  ;;  %v2440_v12 = vld [vmem:[%s3127_s5 + $0x60] sm:$0xff]  }
  0x1f   : > { %1145 = vmatpush1.bf16.msra.mxu0 %v2278_v25  ;;  %1111 = vmatprep.subr.bf16.mxu1 %v2300_v30  ;;  %v2362_v10 = vld [vmem:[%s3125_s3 + $0x14] ss:$28 sps:$4 sm:$0xff]   ;;  %v257_v15 = vld [vmem:[%s3124_s2] sm:$0x3] }
  0x20   : > { %1146 = vmatprep.subr.bf16.mxu0 %v2286_v27  ;;  %v2363_v11 = vld [vmem:[%s3125_s3 + $0x1d8] ss:$28 sps:$4 sm:$0xff]   ;;  %v261_v14 = vsub.s32 0, %v2762_v13  ;;  %v265_v16 = vsub.s32 1, %v2762_v13 }
  0x21   : > { %v2364_v29 = vld [vmem:[%s3125_s3 + $0x18] ss:$28 sps:$4 sm:$0xff]  }
  0x22   : > { %1112 = vmatpush1.bf16.msra.mxu1 %v2305_v32  ;;  %v262_v17 = vrot.slane %v257_v15, %v261_v14  ;;  %v266_v18 = vrot.slane %v257_v15, %v265_v16  ;;  %v2368_v32 = vld [vmem:[%s3125_s3 + $0x210] ss:$28 sps:$4 sm:$0xff]  }
  0x23   : > { %1147 = vmatpush1.bf16.msra.mxu0 %v2284_v28  ;;  %1113 = vmatprep.subr.bf16.mxu1 %v2306_v34  ;;  %v2360_v28 = vld [vmem:[%s3125_s3 + $0x10] ss:$28 sps:$4 sm:$0xff]  }
  0x24   : > { %1148 = vmatprep.subr.bf16.mxu0 %v2292_v31  ;;  %v2367_v31 = vld [vmem:[%s3125_s3 + $0x4c] ss:$28 sps:$4 sm:$0xff]  }
  0x25   : > { %v2369_v34 = vld [vmem:[%s3125_s3 + $0x50] ss:$28 sps:$4 sm:$0xff]  }
  0x26   : > { %1114 = vmatpush1.bf16.msra.mxu1 %v2311_v37  ;;  %v2370_v37 = vld [vmem:[%s3125_s3 + $0x80] ss:$28 sps:$4 sm:$0xff]   ;;  %v2412_v15 = vld [vmem:[%s3125_s3 + $0x2b0] ss:$28 sps:$4 sm:$0xff]  }
  0x27   : > { %1149 = vmatpush1.bf16.msra.mxu0 %v2290_v33  ;;  %1115 = vmatprep.subr.bf16.mxu1 %v2312_v38  ;;  %v2365_v33 = vld [vmem:[%s3125_s3 + $0x48] ss:$28 sps:$4 sm:$0xff]  }
  0x28   : > { %1150 = vmatprep.subr.bf16.mxu0 %v2298_v35  ;;  %v2372_v35 = vld [vmem:[%s3125_s3 + $0x84] ss:$28 sps:$4 sm:$0xff]  }
  0x29   : > { %v2374_v38 = vld [vmem:[%s3125_s3 + $0x88] ss:$28 sps:$4 sm:$0xff]  }
  0x2a   : > { %1116 = vmatpush1.bf16.msra.mxu1 %v2317_v40  ;;  %v2378_v40 = vld [vmem:[%s3125_s3 + $0x280] ss:$28 sps:$4 sm:$0xff]  }
  0x2b   : > { %1151 = vmatpush1.bf16.msra.mxu0 %v2296_v36  ;;  %1117 = vmatprep.subr.bf16.mxu1 %v2318_v42  ;;  %v2373_v36 = vld [vmem:[%s3125_s3 + $0x248] ss:$28 sps:$4 sm:$0xff]   ;;  %v2379_v42 = vld [vmem:[%s3125_s3 + $0xc0] ss:$28 sps:$4 sm:$0xff]  }
  0x2c   : > { %1152 = vmatprep.subr.bf16.mxu0 %v2304_v39  ;;  %v2377_v39 = vld [vmem:[%s3125_s3 + $0xbc] ss:$28 sps:$4 sm:$0xff]  }
  0x2e   : > { %1118 = vmatpush1.bf16.msra.mxu1 %v2323_v46  ;;  %v2384_v46 = vld [vmem:[%s3125_s3 + $0xf8] ss:$28 sps:$4 sm:$0xff]  }
  0x2f   : > { %1153 = vmatpush1.bf16.msra.mxu0 %v2302_v41  ;;  %1119 = vmatprep.subr.bf16.mxu1 %v2324_v47  ;;  %v2375_v41 = vld [vmem:[%s3125_s3 + $0xb8] ss:$28 sps:$4 sm:$0xff]   ;;  %v2387_v47 = vld [vmem:[%s3125_s3 + $0x12c] ss:$28 sps:$4 sm:$0xff]  }
  0x30   : > { %1154 = vmatprep.subr.bf16.mxu0 %v2310_v43  ;;  %v2382_v43 = vld [vmem:[%s3125_s3 + $0xf4] ss:$28 sps:$4 sm:$0xff]  }
  0x32   : > { %1120 = vmatpush1.bf16.msra.mxu1 %v2329_v48  ;;  %v2388_v48 = vld [vmem:[%s3125_s3 + $0x2f0] ss:$28 sps:$4 sm:$0xff]  }
  0x33   : > { %1155 = vmatpush1.bf16.msra.mxu0 %v2308_v44  ;;  %1121 = vmatprep.subr.bf16.mxu1 %v2330_v50  ;;  %v2383_v44 = vld [vmem:[%s3125_s3 + $0x2b8] ss:$28 sps:$4 sm:$0xff]   ;;  %v2389_v50 = vld [vmem:[%s3125_s3 + $0x130] ss:$28 sps:$4 sm:$0xff]  }
  0x34   : > { %1156 = vmatprep.subr.bf16.mxu0 %v2316_v45  ;;  %v2380_v45 = vld [vmem:[%s3125_s3 + $0xf0] ss:$28 sps:$4 sm:$0xff]  }
  0x36   : > { %1122 = vmatpush1.bf16.msra.mxu1 %v2335_v52  ;;  %v2393_v52 = vld [vmem:[%s3125_s3 + $0x328] ss:$28 sps:$4 sm:$0xff]  }
  0x37   : > { %1157 = vmatpush1.bf16.msra.mxu0 %v2314_v49  ;;  %1123 = vmatprep.subr.bf16.mxu1 %v2336_v54  ;;  %v2385_v49 = vld [vmem:[%s3125_s3 + $0x128] ss:$28 sps:$4 sm:$0xff]  }
  0x38   : > { %1158 = vmatprep.subr.bf16.mxu0 %v2322_v51  ;;  %v2392_v51 = vld [vmem:[%s3125_s3 + $0x164] ss:$28 sps:$4 sm:$0xff]  }
  0x39   : > { %v2394_v54 = vld [vmem:[%s3125_s3 + $0x168] ss:$28 sps:$4 sm:$0xff]  }
  0x3a   : > { %1124 = vmatpush1.bf16.msra.mxu1 %v2341_v56  ;;  %v2398_v56 = vld [vmem:[%s3125_s3 + $0x360] ss:$28 sps:$4 sm:$0xff]  }
  0x3b   : > { %1159 = vmatpush1.bf16.msra.mxu0 %v2320_v53  ;;  %1125 = vmatprep.subr.bf16.mxu1 %v2342_v58  ;;  %v2390_v53 = vld [vmem:[%s3125_s3 + $0x160] ss:$28 sps:$4 sm:$0xff]  }
  0x3c   : > { %1160 = vmatprep.subr.bf16.mxu0 %v2328_v55  ;;  %v2397_v55 = vld [vmem:[%s3125_s3 + $0x19c] ss:$28 sps:$4 sm:$0xff]  }
  0x3d   : > { %v2399_v58 = vld [vmem:[%s3125_s3 + $0x1a0] ss:$28 sps:$4 sm:$0xff]  }
  0x3e   : > { %1126 = vmatpush1.bf16.msra.mxu1 %v2347_v60  ;;  %v2424_v60 = vld [vmem:[%s3127_s5 + $0x40] sm:$0xff]  }
  0x3f   : > { %1161 = vmatpush1.bf16.msra.mxu0 %v2326_v57  ;;  %1127 = vmatprep.subr.bf16.mxu1 %v2348_v2  ;;  %v2395_v57 = vld [vmem:[%s3125_s3 + $0x198] ss:$28 sps:$4 sm:$0xff]   ;;  %v2430_v2 = vld [vmem:[%s3127_s5 + $0x8] sm:$0xff]  }
  0x40   : > { %1162 = vmatprep.subr.bf16.mxu0 %v2334_v59  ;;  %v2402_v59 = vld [vmem:[%s3125_s3 + $0x1d4] ss:$28 sps:$4 sm:$0xff]  }
  0x42   : > { %1128 = vmatpush1.bf16.msra.mxu1 %v2353_v5  ;;  %v2406_v5 = vld [vmem:[%s3125_s3 + $0x240] ss:$28 sps:$4 sm:$0xff]  }
  0x43   : > { %1163 = vmatpush1.bf16.msra.mxu0 %v2332_v61  ;;  %1129 = vmatprep.subr.bf16.mxu1 %v2354_v6  ;;  %v2400_v61 = vld [vmem:[%s3125_s3 + $0x1d0] ss:$28 sps:$4 sm:$0xff]  }
  0x44   : > { %1164 = vmatprep.subr.bf16.mxu0 %v2340_v62  ;;  %v2426_v62 = vld [vmem:[%s3127_s5] sm:$0xff]   ;;  %v2434_v6 = vld [vmem:[%s3127_s5 + $0x10] sm:$0xff]  }
  0x46   : > { %1130 = vmatpush1.bf16.msra.mxu1 %v2359_v9  ;;  %v2409_v9 = vld [vmem:[%s3125_s3 + $0x278] ss:$28 sps:$4 sm:$0xff]  }
  0x47   : > { %1165 = vmatpush1.bf16.msra.mxu0 %v2338_v63  ;;  %1181 = vmatprep.subr.bf16.mxu1 %v2362_v10  ;;  %v2405_v63 = vld [vmem:[%s3125_s3 + $0x20c] ss:$28 sps:$4 sm:$0xff]   ;;  %v2438_v10 = vld [vmem:[%s3127_s5 + $0x18] sm:$0xff]  }
  0x48   : > { %1166 = vmatprep.subr.bf16.mxu0 %v2346_v0  ;;  %v2428_v0 = vld [vmem:[%s3127_s5 + $0x48] sm:$0xff]  }
  0x4b   : > { %1167 = vmatpush1.bf16.msra.mxu0 %v2344_v1  ;;  %v2403_v1 = vld [vmem:[%s3125_s3 + $0x208] ss:$28 sps:$4 sm:$0xff]  }
  0x4c   : > { %1168 = vmatprep.subr.bf16.mxu0 %v2352_v3  ;;  %v2408_v3 = vld [vmem:[%s3125_s3 + $0x244] ss:$28 sps:$4 sm:$0xff]  }
  0x4f   : > { %1169 = vmatpush1.bf16.msra.mxu0 %v2350_v4  ;;  %v2432_v4 = vld [vmem:[%s3127_s5 + $0x50] sm:$0xff]  }
  0x50   : > { %1170 = vmatprep.subr.bf16.mxu0 %v2358_v7  ;;  %v2411_v7 = vld [vmem:[%s3125_s3 + $0x27c] ss:$28 sps:$4 sm:$0xff]  }
  0x53   : > { %1171 = vmatpush1.bf16.msra.mxu0 %v2356_v8  ;;  %v2436_v8 = vld [vmem:[%s3127_s5 + $0x58] sm:$0xff]  }
  0x54   : > { %2124 = vmatprep.subr.bf16.mxu0 %v2363_v11  ;;  %v2414_v11 = vld [vmem:[%s3125_s3 + $0x2b4] ss:$28 sps:$4 sm:$0xff]  }
  0xe9   : > { %v347_v19 = vpop.f32.mrb[0].mxu0 }
  0xea   : > { %v348_v20 = vadd.f32 %v347_v19, %v262_v17  ;;  %v349_v21 = vpop.f32.mrb[1].mxu0  ;;  %v2442_v17 = vld [vmem:[%s3127_s5 + $0x20] sm:$0xff]   ;;  %v2444_v19 = vld [vmem:[%s3127_s5 + $0x68] sm:$0xff]  }
  0xeb   : > { %v350_v22 = vadd.f32 %v349_v21, %v266_v18  ;;  %v351_v23 = vpop.f32.mrb[2].mxu0  ;;  %v2417_v18 = vld [vmem:[%s3125_s3 + $0x2ec] ss:$28 sps:$4 sm:$0xff]  }
  0xec   : > { %v354_v24 = vmax.f32 %v348_v20, 0.0  ;;  %v352_v25 = vpop.f32.mrb[3].mxu0  ;;  %v2415_v20 = vld [vmem:[%s3125_s3 + $0x2e8] ss:$28 sps:$4 sm:$0xff]   ;;  %v2418_v23 = vld [vmem:[%s3125_s3 + $0x320] ss:$28 sps:$4 sm:$0xff]  }
  0xed   : > { %v355_v26 = vmax.f32 %v350_v22, 0.0  ;;  %v2446_v21 = vld [vmem:[%s3127_s5 + $0x28] sm:$0xff]   ;;  %v2420_v22 = vld [vmem:[%s3125_s3 + $0x324] ss:$28 sps:$4 sm:$0xff]   ;;  %v2421_v25 = vld [vmem:[%s3125_s3 + $0x358] ss:$28 sps:$4 sm:$0xff]  }
  0xee   : > { %v2779_v30 = vpack.c.bf16 %v354_v24, %v354_v24  ;;  %v2423_v24 = vld [vmem:[%s3125_s3 + $0x35c] ss:$28 sps:$4 sm:$0xff]  }
  0xef   : > { %v357_v27 = vpack.c.bf16 %v355_v26, %v355_v26  ;;  %v2425_v26 = vld [vmem:[%s3127_s5 + $0xc0] sm:$0xff]  }
  0xf1   : > { %1131 = vmatprep.mubr.bf16.mxu1 %v357_v27  ;;  %1172 = vmatprep.mubr.bf16.mxu0 %v357_v27 }
  0xf2   : > { %1132 = vmatmul.mubr.bf16.vlgmr.msra.gmra.mrb[0].mxu1 %v2779_v30  ;;  %1173 = vmatmul.mubr.bf16.vlgmr.msra.gmra.mrb[4].mxu0 %v2779_v30 }
  0xf3   : > { %1182 = vmatpush1.bf16.msra.mxu1 %v2360_v28  ;;  %2125 = vmatpush3.bf16.msra.mxu0 %v2364_v29  ;;  %v2429_v28 = vld [vmem:[%s3127_s5 + $0xc8] sm:$0xff]  }
  0xf4   : > { %1213 = vmatprep.mubr.bf16.mxu1 %v357_v27  ;;  %1254 = vmatprep.mubr.bf16.mxu0 %v357_v27  ;;  %v2427_v27 = vld [vmem:[%s3127_s5 + $0x80] sm:$0xff]   ;;  %v2431_v29 = vld [vmem:[%s3127_s5 + $0x88] sm:$0xff]  }
  0xf5   : > { %1183 = vmatprep.subr.bf16.mxu1 %v2367_v31  ;;  %2126 = vmatprep.subr.bf16.mxu0 %v2368_v32  ;;  %v2433_v31 = vld [vmem:[%s3127_s5 + $0xd0] sm:$0xff]  }
  0xf6   : > { %v2435_v32 = vld [vmem:[%s3127_s5 + $0x90] sm:$0xff]  }
  0xf7   : > { %1184 = vmatpush1.bf16.msra.mxu1 %v2365_v33  ;;  %2127 = vmatpush3.bf16.msra.mxu0 %v2369_v34  ;;  %v2439_v33 = vld [vmem:[%s3127_s5 + $0x98] sm:$0xff]   ;;  %v2441_v34 = vld [vmem:[%s3127_s5 + $0xe0] sm:$0xff]  }
  0xf8   : > { %1185 = vmatprep.subr.bf16.mxu1 %v2372_v35  ;;  %2128 = vmatprep.subr.bf16.mxu0 %v2373_v36  ;;  %v2443_v35 = vld [vmem:[%s3127_s5 + $0xa0] sm:$0xff]   ;;  %v2445_v36 = vld [vmem:[%s3127_s5 + $0xe8] sm:$0xff]  }
  0xfb   : > { %1186 = vmatpush1.bf16.msra.mxu1 %v2370_v37  ;;  %2129 = vmatpush3.bf16.msra.mxu0 %v2374_v38  ;;  %v2447_v37 = vld [vmem:[%s3127_s5 + $0xa8] sm:$0xff]   ;;  %v2448_v38 = vld [vmem:[%s3127_s5 + $0x70] sm:$0xff]  }
  0xfc   : > { %1187 = vmatprep.subr.bf16.mxu1 %v2377_v39  ;;  %2130 = vmatprep.subr.bf16.mxu0 %v2378_v40  ;;  %v2449_v39 = vld [vmem:[%s3127_s5 + $0xf0] sm:$0xff]  }
  0xfd   : > { %v2450_v40 = vld [vmem:[%s3127_s5 + $0x30] sm:$0xff]  }
  0xff   : > { %1188 = vmatpush1.bf16.msra.mxu1 %v2375_v41  ;;  %2131 = vmatpush3.bf16.msra.mxu0 %v2379_v42  ;;  %v2451_v41 = vld [vmem:[%s3127_s5 + $0xb0] sm:$0xff]   ;;  %v2452_v42 = vld [vmem:[%s3127_s5 + $0x78] sm:$0xff]  }
 0x100   : > { %1189 = vmatprep.subr.bf16.mxu1 %v2382_v43  ;;  %2132 = vmatprep.subr.bf16.mxu0 %v2383_v44  ;;  %v2453_v43 = vld [vmem:[%s3127_s5 + $0xf8] sm:$0xff]  }
 0x101   : > { %v2454_v44 = vld [vmem:[%s3127_s5 + $0x38] sm:$0xff]  }
 0x103   : > { %1190 = vmatpush1.bf16.msra.mxu1 %v2380_v45  ;;  %2133 = vmatpush3.bf16.msra.mxu0 %v2384_v46  ;;  %v2455_v45 = vld [vmem:[%s3127_s5 + $0xb8] sm:$0xff]   ;;  %v2489_v46 = vmov 0.0  }
 0x104   : > { %1191 = vmatprep.subr.bf16.mxu1 %v2387_v47  ;;  %2134 = vmatprep.subr.bf16.mxu0 %v2388_v48  ;;  %v2464_v47 = vld [vmem:[%s3127_s5 + $0x140] sm:$0xff]   ;;  %v498_v48 = vsub.s32 2, %v2762_v13 }
 0x107   : > { %1192 = vmatpush1.bf16.msra.mxu1 %v2385_v49  ;;  %2135 = vmatpush3.bf16.msra.mxu0 %v2389_v50  ;;  %v3021_v49 = vld [vmem:[%s3126_s4] sm:$0xff]  ;;  %v502_v50 = vsub.s32 3, %v2762_v13 }
 0x108   : > { %1193 = vmatprep.subr.bf16.mxu1 %v2392_v51  ;;  %2136 = vmatprep.subr.bf16.mxu0 %v2393_v52  ;;  %v491_v51 = vrot.slane %v3021_v49, %v261_v14  ;;  %v499_v52 = vrot.slane %v3021_v49, %v498_v48 }
 0x10b   : > { %1194 = vmatpush1.bf16.msra.mxu1 %v2390_v53  ;;  %2137 = vmatpush3.bf16.msra.mxu0 %v2394_v54  ;;  %v495_v53 = vrot.slane %v3021_v49, %v265_v16  ;;  %v503_v54 = vrot.slane %v3021_v49, %v502_v50 }
 0x10c   : > { %1195 = vmatprep.subr.bf16.mxu1 %v2397_v55  ;;  %2138 = vmatprep.subr.bf16.mxu0 %v2398_v56 }
 0x10f   : > { %1196 = vmatpush1.bf16.msra.mxu1 %v2395_v57  ;;  %2139 = vmatpush3.bf16.msra.mxu0 %v2399_v58 }
 0x110   : > { %1197 = vmatprep.subr.bf16.mxu1 %v2402_v59  ;;  %2146 = vmatprep.subr.bf16.mxu0 %v2424_v60 }
 0x112   : > { %1255 = vmatmul.mubr.bf16.vlgmr.msra.gmra.mrb[8].mxu0 %v2779_v30 }
 0x113   : > { %1198 = vmatpush1.bf16.msra.mxu1 %v2400_v61  ;;  %2147 = vmatpush3.bf16.msra.mxu0 %v2426_v62 }
 0x114   : > { %1199 = vmatprep.subr.bf16.mxu1 %v2405_v63  ;;  %2148 = vmatprep.subr.bf16.mxu0 %v2428_v0 }
 0x117   : > { %1200 = vmatpush1.bf16.msra.mxu1 %v2403_v1  ;;  %2149 = vmatpush3.bf16.msra.mxu0 %v2430_v2 }
 0x118   : > { %1201 = vmatprep.subr.bf16.mxu1 %v2408_v3  ;;  %2150 = vmatprep.subr.bf16.mxu0 %v2432_v4 }
 0x11b   : > { %1202 = vmatpush1.bf16.msra.mxu1 %v2406_v5  ;;  %2151 = vmatpush3.bf16.msra.mxu0 %v2434_v6 }
 0x11c   : > { %1203 = vmatprep.subr.bf16.mxu1 %v2411_v7  ;;  %2152 = vmatprep.subr.bf16.mxu0 %v2436_v8  ;;  %v2456_v7 = vld [vmem:[%s3127_s5 + $0x180] sm:$0xff]  }
 0x11f   : > { %1204 = vmatpush1.bf16.msra.mxu1 %v2409_v9  ;;  %2153 = vmatpush3.bf16.msra.mxu0 %v2438_v10  ;;  %v2465_v10 = vld [vmem:[%s3127_s5 + $0x100] sm:$0xff]  }
 0x120   : > { %1205 = vmatprep.subr.bf16.mxu1 %v2414_v11  ;;  %2154 = vmatprep.subr.bf16.mxu0 %v2440_v12  ;;  %v2466_v11 = vld [vmem:[%s3127_s5 + $0x148] sm:$0xff]  }
 0x121   : > { %v2457_v12 = vld [vmem:[%s3127_s5 + $0x188] sm:$0xff]  }
 0x123   : > { %1206 = vmatpush1.bf16.msra.mxu1 %v2412_v15  ;;  %2155 = vmatpush3.bf16.msra.mxu0 %v2442_v17  ;;  %v2467_v15 = vld [vmem:[%s3127_s5 + $0x108] sm:$0xff]   ;;  %v2468_v17 = vld [vmem:[%s3127_s5 + $0x150] sm:$0xff]  }
 0x124   : > { %1207 = vmatprep.subr.bf16.mxu1 %v2417_v18  ;;  %2156 = vmatprep.subr.bf16.mxu0 %v2444_v19  ;;  %v2458_v18 = vld [vmem:[%s3127_s5 + $0x190] sm:$0xff]  }
 0x125   : > { %v2469_v19 = vld [vmem:[%s3127_s5 + $0x110] sm:$0xff]  }
 0x127   : > { %1208 = vmatpush1.bf16.msra.mxu1 %v2415_v20  ;;  %2157 = vmatpush3.bf16.msra.mxu0 %v2446_v21  ;;  %v2470_v20 = vld [vmem:[%s3127_s5 + $0x158] sm:$0xff]  }
 0x128   : > { %1209 = vmatprep.subr.bf16.mxu1 %v2420_v22  ;;  %2158 = vmatprep.subr.bf16.mxu0 %v2448_v38  ;;  %v2459_v21 = vld [vmem:[%s3127_s5 + $0x198] sm:$0xff]  }
 0x129   : > { %v2471_v22 = vld [vmem:[%s3127_s5 + $0x118] sm:$0xff]  }
 0x12b   : > { %1210 = vmatpush1.bf16.msra.mxu1 %v2418_v23  ;;  %2159 = vmatpush3.bf16.msra.mxu0 %v2450_v40  ;;  %v2472_v23 = vld [vmem:[%s3127_s5 + $0x160] sm:$0xff]  }
 0x12c   : > { %1211 = vmatprep.subr.bf16.mxu1 %v2423_v24  ;;  %2160 = vmatprep.subr.bf16.mxu0 %v2452_v42  ;;  %v2460_v24 = vld [vmem:[%s3127_s5 + $0x1a0] sm:$0xff]  }
 0x12f   : > { %1212 = vmatpush1.bf16.msra.mxu1 %v2421_v25  ;;  %2161 = vmatpush3.bf16.msra.mxu0 %v2454_v44  ;;  %v2473_v25 = vld [vmem:[%s3127_s5 + $0x120] sm:$0xff]  }
 0x130   : > { %2168 = vmatprep.subr.bf16.mxu1 %v2425_v26  ;;  %2190 = vmatprep.subr.bf16.mxu0 %v2464_v47  ;;  %v2474_v26 = vld [vmem:[%s3127_s5 + $0x168] sm:$0xff]   ;;  %v510_v47 = vsub.s32 5, %v2762_v13 }
 0x132   : > { %1214 = vmatmul.mubr.bf16.vlgmr.msra.gmra.mrb[4].mxu1 %v2779_v30  ;;  %v2437_v30 = vld [vmem:[%s3127_s5 + $0xd8] sm:$0xff]  }
 0x133   : > { %2169 = vmatpush3.bf16.msra.mxu1 %v2427_v27  ;;  %v2461_v27 = vld [vmem:[%s3127_s5 + $0x1a8] sm:$0xff]  }
 0x134   : > { %2170 = vmatprep.subr.bf16.mxu1 %v2429_v28  ;;  %v2475_v28 = vld [vmem:[%s3127_s5 + $0x128] sm:$0xff]  }
 0x137   : > { %2171 = vmatpush3.bf16.msra.mxu1 %v2431_v29  ;;  %v514_v29 = vsub.s32 6, %v2762_v13 }
 0x138   : > { %2172 = vmatprep.subr.bf16.mxu1 %v2433_v31  ;;  %v2476_v31 = vld [vmem:[%s3127_s5 + $0x170] sm:$0xff]  }
 0x13b   : > { %2173 = vmatpush3.bf16.msra.mxu1 %v2435_v32  ;;  %v2462_v32 = vld [vmem:[%s3127_s5 + $0x1b0] sm:$0xff]  }
 0x13c   : > { %2174 = vmatprep.subr.bf16.mxu1 %v2437_v30  ;;  %v2477_v30 = vld [vmem:[%s3127_s5 + $0x130] sm:$0xff]  }
 0x13f   : > { %2175 = vmatpush3.bf16.msra.mxu1 %v2439_v33 }
 0x140   : > { %2176 = vmatprep.subr.bf16.mxu1 %v2441_v34  ;;  %v515_v34 = vrot.slane %v3021_v49, %v514_v29 }
 0x143   : > { %2177 = vmatpush3.bf16.msra.mxu1 %v2443_v35  ;;  %v2478_v35 = vld [vmem:[%s3127_s5 + $0x178] sm:$0xff]  }
 0x144   : > { %2178 = vmatprep.subr.bf16.mxu1 %v2445_v36 }
 0x147   : > { %2179 = vmatpush3.bf16.msra.mxu1 %v2447_v37 }
 0x148   : > { %2180 = vmatprep.subr.bf16.mxu1 %v2449_v39  ;;  %v2463_v39 = vld [vmem:[%s3127_s5 + $0x1b8] sm:$0xff]  }
 0x14b   : > { %2181 = vmatpush3.bf16.msra.mxu1 %v2451_v41  ;;  %v2479_v41 = vld [vmem:[%s3127_s5 + $0x138] sm:$0xff]  }
 0x14c   : > { %2182 = vmatprep.subr.bf16.mxu1 %v2453_v43 }
 0x14f   : > { %2183 = vmatpush3.bf16.msra.mxu1 %v2455_v45  ;;  %v506_v45 = vsub.s32 4, %v2762_v13 }
 0x150   : > { %2221 = vmatprep.subr.bf16.mxu1 %v2489_v46 }
 0x151   : > { %v507_v48 = vrot.slane %v3021_v49, %v506_v45 }
 0x1c5   : > { %v1133_v55 = vpop.f32.mrb[0].mxu1  ;;  %v1174_v56 = vpop.f32.mrb[4].mxu0 }
 0x1c6   : > { %v1134_v57 = vadd.f32 %v1133_v55, %v491_v51  ;;  %v1175_v58 = vadd.f32 %v1174_v56, %v499_v52  ;;  %v1135_v59 = vpop.f32.mrb[1].mxu1  ;;  %v1176_v60 = vpop.f32.mrb[5].mxu0 }
 0x1c7   : > { %v1136_v61 = vadd.f32 %v1135_v59, %v495_v53  ;;  %v1177_v62 = vadd.f32 %v1176_v60, %v503_v54  ;;  %v1137_v63 = vpop.f32.mrb[2].mxu1  ;;  %v1178_v0 = vpop.f32.mrb[6].mxu0 }
 0x1c8   : > { %v1262_v1 = vmax.f32 %v1134_v57, 0.0  ;;  %v1264_v14 = vmax.f32 %v1175_v58, 0.0  ;;  %v1138_v2 = vpop.f32.mrb[3].mxu1  ;;  %v1179_v3 = vpop.f32.mrb[7].mxu0 }
 0x1c9   : > { %v1263_v4 = vmax.f32 %v1136_v61, 0.0  ;;  %v1265_v5 = vmax.f32 %v1177_v62, 0.0 }
 0x1ca   : > { %v1269_v8 = vpack.c.bf16 %v1262_v1, %v1262_v1  ;;  %v1271_v9 = vpack.c.bf16 %v1264_v14, %v1264_v14 }
 0x1cb   : > { %v1270_v6 = vpack.c.bf16 %v1263_v4, %v1263_v4  ;;  %v1272_v16 = vpack.c.bf16 %v1265_v5, %v1265_v5 }
 0x1cd   : > { %1756 = vmatprep.mubr.bf16.mxu0 %v1270_v6  ;;  %1796 = vmatprep.mubr.bf16.mxu1 %v1272_v16 }
 0x1ce   : > { %1757 = vmatmul.mubr.bf16.vlgmr.msra.gmra.mrb[12].mxu0 %v1269_v8  ;;  %1797 = vmatmul.mubr.bf16.vlgmr.msra.gmra.mrb[8].mxu1 %v1271_v9 }
 0x1cf   : > { %2222 = vmatpush3.bf16.msra.mxu1 %v2456_v7  ;;  %2237 = vmatprep.mubr.msk.bf16.mxu1 %vm2490_vm1, %v2489_v46 }
 0x1d0   : > { %2223 = vmatprep.subr.bf16.mxu1 %v2489_v46  ;;  %2191 = vmatpush3.bf16.msra.mxu0 %v2465_v10 }
 0x1d1   : > { %2192 = vmatprep.subr.bf16.mxu0 %v2466_v11 }
 0x1d3   : > { %2224 = vmatpush3.bf16.msra.mxu1 %v2457_v12 }
 0x1d4   : > { %2225 = vmatprep.subr.bf16.mxu1 %v2489_v46  ;;  %2193 = vmatpush3.bf16.msra.mxu0 %v2467_v15 }
 0x1d5   : > { %2194 = vmatprep.subr.bf16.mxu0 %v2468_v17 }
 0x1d7   : > { %2226 = vmatpush3.bf16.msra.mxu1 %v2458_v18 }
 0x1d8   : > { %2227 = vmatprep.subr.bf16.mxu1 %v2489_v46  ;;  %2195 = vmatpush3.bf16.msra.mxu0 %v2469_v19 }
 0x1d9   : > { %2196 = vmatprep.subr.bf16.mxu0 %v2470_v20 }
 0x1db   : > { %2228 = vmatpush3.bf16.msra.mxu1 %v2459_v21 }
 0x1dc   : > { %2229 = vmatprep.subr.bf16.mxu1 %v2489_v46  ;;  %2197 = vmatpush3.bf16.msra.mxu0 %v2471_v22 }
 0x1dd   : > { %2198 = vmatprep.subr.bf16.mxu0 %v2472_v23 }
 0x1df   : > { %2230 = vmatpush3.bf16.msra.mxu1 %v2460_v24 }
 0x1e0   : > { %2231 = vmatprep.subr.bf16.mxu1 %v2489_v46  ;;  %2199 = vmatpush3.bf16.msra.mxu0 %v2473_v25 }
 0x1e1   : > { %2200 = vmatprep.subr.bf16.mxu0 %v2474_v26 }
 0x1e3   : > { %2232 = vmatpush3.bf16.msra.mxu1 %v2461_v27 }
 0x1e4   : > { %2233 = vmatprep.subr.bf16.mxu1 %v2489_v46  ;;  %2201 = vmatpush3.bf16.msra.mxu0 %v2475_v28 }
 0x1e5   : > { %v2140_v33 = vpop.f32.mrb[8].mxu0  ;;  %2202 = vmatprep.subr.bf16.mxu0 %v2476_v31 }
 0x1e6   : > { %v2141_v36 = vpop.f32.mrb[9].mxu0 }
 0x1e7   : > { %v2142_v37 = vadd.f32 %v2141_v36, %v2140_v33  ;;  %v2143_v38 = vpop.f32.mrb[10].mxu0  ;;  %2234 = vmatpush3.bf16.msra.mxu1 %v2462_v32 }
 0x1e8   : > { %v2144_v40 = vpop.f32.mrb[11].mxu0  ;;  %2235 = vmatprep.subr.bf16.mxu1 %v2489_v46  ;;  %2203 = vmatpush3.bf16.msra.mxu0 %v2477_v30  ;;  %v511_v46 = vrot.slane %v3021_v49, %v510_v47 }
 0x1e9   : > { %v1257_v42 = vadd.f32 %v2142_v37, %v515_v34  ;;  %2204 = vmatprep.subr.bf16.mxu0 %v2478_v35 }
 0x1eb   : > { %v1268_v43 = vmax.f32 %v1257_v42, 0.0  ;;  %2236 = vmatpush3.bf16.msra.mxu1 %v2463_v39 }
 0x1ec   : > { %2205 = vmatpush3.bf16.msra.mxu0 %v2479_v41 }
 0x1ed   : > { %v1275_v44 = vpack.c.bf16 %v1268_v43, %v1268_v43 }
 0x1ef   : > { %2238 = vmatmul.mubr.bf16.vlgmr.msra.gmra.mrb[12].mxu1 %v1275_v44 }
 0x205   : > { %v1215_v50 = vpop.f32.mrb[4].mxu1 }
 0x206   : > { %v1216_v51 = vadd.f32 %v1215_v50, %v507_v48  ;;  %v1217_v52 = vpop.f32.mrb[5].mxu1 }
 0x207   : > { %v1218_v53 = vadd.f32 %v1217_v52, %v511_v46  ;;  %v1219_v54 = vpop.f32.mrb[6].mxu1 }
 0x208   : > { %v1266_v55 = vmax.f32 %v1216_v51, 0.0  ;;  %v1220_v56 = vpop.f32.mrb[7].mxu1 }
 0x209   : > { %v1267_v57 = vmax.f32 %v1218_v53, 0.0 }
 0x20a   : > { %v1273_v59 = vpack.c.bf16 %v1266_v55, %v1266_v55 }
 0x20b   : > { %v1274_v58 = vpack.c.bf16 %v1267_v57, %v1267_v57 }
 0x20d   : > { %1836 = vmatprep.mubr.bf16.mxu0 %v1274_v58 }
 0x20e   : > { %1837 = vmatmul.mubr.bf16.vlgmr.msra.gmra.mrb[16].mxu0 %v1273_v59 }
 0x2a1   : > { %v2162_v60 = vpop.f32.mrb[12].mxu0  ;;  %v2184_v61 = vpop.f32.mrb[8].mxu1 }
 0x2a2   : > { %v2163_v13 = vpop.f32.mrb[13].mxu0  ;;  %v2185_v62 = vpop.f32.mrb[9].mxu1 }
 0x2a3   : > { %v2164_v63 = vadd.f32 %v2163_v13, %v2162_v60  ;;  %v2186_v0 = vadd.f32 %v2185_v62, %v2184_v61  ;;  %v2165_v49 = vpop.f32.mrb[14].mxu0  ;;  %v2187_v1 = vpop.f32.mrb[10].mxu1 }
 0x2a4   : > { %v2166_v14 = vpop.f32.mrb[15].mxu0  ;;  %v2188_v2 = vpop.f32.mrb[11].mxu1 }
 0x2a5   : > { %v1799_v3 = vadd.f32 %v2186_v0, %v2164_v63 }
 0x2c2   : > { %v1878_v4 = vpop.f32.mrb[12].mxu1 }
 0x2c3   : > { %v2239_v5 = vpop.f32.mrb[13].mxu1 }
 0x2c4   : > { %v1881_v6 = vpop.f32.mrb[14].mxu1 }
 0x2c5   : > { %v2240_v16 = vpop.f32.mrb[15].mxu1 }
 0x2e1   : > { %v2206_v7 = vpop.f32.mrb[16].mxu0 }
 0x2e2   : > { %v2207_v8 = vpop.f32.mrb[17].mxu0 }
 0x2e3   : > { %v2208_v9 = vadd.f32 %v2207_v8, %v2206_v7  ;;  %v2209_v10 = vpop.f32.mrb[18].mxu0 }
 0x2e4   : > { %v2210_v11 = vpop.f32.mrb[19].mxu0 }
 0x2e5   : > { %v1839_v12 = vadd.f32 %v2208_v9, %v1799_v3 }
 0x2e7   : > { %v1879_v15 = vadd.f32 %v1878_v4, %v1839_v12 }
 0x2e9   : > { %1884 = vst [vmem:[%s246_s10] sm:$0xff] %v1879_v15 }
 0x2ea PF: > { %s16_s21 = sadd.s32 1, %s2486_s21  }
 0x2eb   : > { %p13_p4 = scmp.ge.s32.totalorder %s16_s21, 4  }
 0x2ed   :  { %15 = sbr.rel (!%p13_p4) target bundleno = 1 (0x1), region = 74 }

</bundles_post_ra>
